<compile_context>
chip_gen: v7x
topology: tpu7x:2x2x1
jax: 0.10.0
libtpu: 0.0.40
codegen_flags: <defaults>
</compile_context>

<pallas_src>
import functools
from math import sqrt

import jax
import jax.numpy as jnp
from jax.experimental import pallas as pl
from jax.experimental.pallas import tpu as pltpu

_MIB = 1024 * 1024


def _rmsnorm_kernel(x_ref, w_ref, o_ref, *, eps):
    # x_ref: (tile_rows, d_model) block; w_ref: (1, d_model), resident across the grid.
    xf = x_ref[...].astype(jnp.float32)
    # Reference semantics: rsqrt(sum(x^2, -1) + eps)   (sum, NOT mean).
    ss = jnp.sum(xf * xf, axis=-1, keepdims=True)        # f32 accumulation (VPU + XLU)
    inv = jax.lax.rsqrt(ss + eps)                         # EUP rsqrt, (tile_rows, 1), f32
    w = w_ref[...].astype(jnp.float32)
    # All math in f32 (HBM-bound kernel -> f32 VPU work is free); single cast at store.
    o_ref[...] = (w * xf * inv).astype(o_ref.dtype)


def _physical_vmem_bytes():
    """Per-core physical VMEM, with a conservative fallback (v7x's 64 MiB)."""
    try:
        info = pltpu.get_tpu_info()
        vmem = int(getattr(info, "vmem_capacity_bytes", 0) or 0)
        if vmem > 0:
            return vmem
    except Exception:
        pass
    return 64 * _MIB


def _choose_tile_rows(rows, d_model, itemsize, budget_bytes):
    """Row tile targeting multi-MiB blocks, pack-aligned, with >= ~4 grid steps."""
    # Sublane packing per element width: f32 -> 8, bf16 -> 16, int8/fp8 -> 32.
    pack = {4: 8, 2: 16, 1: 32}.get(itemsize, 8)
    bytes_per_row = d_model * itemsize

    # Target per-buffer tile: ~8 MiB (amortizes ~0.35 us/step), but never more than
    # 1/4 of the pipeline-buffer budget (2 double-buffers x (in + out) tiles).
    target_tile_bytes = min(8 * _MIB, budget_bytes // 4)
    tile = max(pack, target_tile_bytes // bytes_per_row)

    # Keep at least ~4 grid steps when the problem is big enough: pipeline overlap
    # (DMA-in / compute / writeback) + 2 blocks per TensorCore on v7x.
    min_blocks = 4
    per_block = -(-rows // min_blocks)            # cdiv(rows, min_blocks)
    per_block = -(-per_block // pack) * pack      # round up to sublane pack
    tile = min(tile, per_block)

    # Round down to the sublane pack; never below one pack.
    tile = max(pack, (tile // pack) * pack)

    # Don't tile beyond the (pack-rounded) problem size.
    rows_rounded = -(-rows // pack) * pack
    return int(max(pack, min(tile, rows_rounded)))


def rmsnorm(x, weight, eps=1e-6, tile_rows=None):
    """x: (..., d_model), weight: (d_model,). Returns weight * x * rsqrt(sum(x^2,-1)+eps)."""
    orig_shape = x.shape
    d_model = orig_shape[-1]
    x2d = x.reshape(-1, d_model)
    rows = x2d.shape[0]
    itemsize = jnp.dtype(x.dtype).itemsize

    phys_vmem = _physical_vmem_bytes()
    pipeline_budget = (phys_vmem * 55) // 100     # ~70 MiB on v5e/v6e, ~35 MiB on v7x
    if tile_rows is None:
        tile_rows = _choose_tile_rows(rows, d_model, itemsize, pipeline_budget)

    w2d = weight.reshape(1, d_model)

    # Scoped VMEM: 2 double-buffers x (in + out) tiles + weight (default-double-buffered;
    # pl.Buffered(1) on the pinned weight would save only a few KiB) + 25% headroom.
    tile_bytes = tile_rows * d_model * itemsize
    w_bytes = d_model * jnp.dtype(weight.dtype).itemsize
    needed = 4 * tile_bytes + 2 * w_bytes
    vmem_ceiling = (phys_vmem * 75) // 100        # ~96 MiB on 128 MiB parts, ~48 MiB on v7x
    vmem_limit = int(min(vmem_ceiling, max(needed * 5 // 4 + _MIB, 16 * _MIB)))

    grid = (pl.cdiv(rows, tile_rows),)  # partial last block handled by Pallas masking

    out = pl.pallas_call(
        functools.partial(_rmsnorm_kernel, eps=eps),
        out_shape=jax.ShapeDtypeStruct((rows, d_model), x.dtype),
        grid_spec=pltpu.PrefetchScalarGridSpec(
            num_scalar_prefetch=0,
            grid=grid,
            in_specs=[
                pl.BlockSpec((tile_rows, d_model), lambda i: (i, 0)),
                pl.BlockSpec((1, d_model), lambda i: (0, 0)),  # pinned: stays resident
            ],
            out_specs=pl.BlockSpec((tile_rows, d_model), lambda i: (i, 0)),
        ),
        compiler_params=pltpu.CompilerParams(
            dimension_semantics=("parallel",),   # shards the row axis across v7x's 2 TCs
            vmem_limit_bytes=vmem_limit,
        ),
    )(x2d, w2d)

    return out.reshape(orig_shape)


if __name__ == "__main__":
    key = jax.random.PRNGKey(0)
    k_w, k_x, k_w2, k_x2, k_w3, k_x3 = jax.random.split(key, 6)
    eps = 1e-6

    def ref_rmsnorm(x, w, eps):
        xf = x.astype(jnp.float32)
        return (w.astype(jnp.float32) * xf *
                jax.lax.rsqrt(jnp.sum(xf * xf, axis=-1, keepdims=True) + eps))

    # Case 1: lane-dense d_model (multiple of 128), f32.
    batch, seq, d_model = 2, 8, 128
    weight = 1.0 + jax.random.normal(k_w, (d_model,), jnp.float32) * sqrt(1.0 / d_model)
    x = jax.random.normal(k_x, (batch, seq, d_model), jnp.float32)
    out = jax.block_until_ready(rmsnorm(x, weight, eps=eps))
    assert out.shape == x.shape and out.dtype == x.dtype
    assert jnp.allclose(out.astype(jnp.float32), ref_rmsnorm(x, weight, eps),
                        atol=1e-5, rtol=1e-5), "f32 lane-dense mismatch vs reference"

    # Case 2: small d_model (== full array dim, sub-128 lanes) and a row count that is
    # NOT a multiple of the tile — exercises the masked partial last block with no
    # host-side padding or output slicing.
    b2, s2, d2 = 3, 5, 32
    weight2 = 1.0 + jax.random.normal(k_w2, (d2,), jnp.float32) * sqrt(1.0 / d2)
    x2 = jax.random.normal(k_x2, (b2, s2, d2), jnp.float32)
    out2 = jax.block_until_ready(rmsnorm(x2, weight2, eps=eps))
    assert out2.shape == x2.shape
    assert jnp.allclose(out2.astype(jnp.float32), ref_rmsnorm(x2, weight2, eps),
                        atol=1e-5, rtol=1e-5), "partial-block mismatch vs reference"

    # Case 3: bf16 inputs — all internal math in f32, single cast at the store.
    b3, s3, d3 = 4, 7, 128
    weight3 = (1.0 + jax.random.normal(k_w3, (d3,), jnp.float32)
               * sqrt(1.0 / d3)).astype(jnp.bfloat16)
    x3 = jax.random.normal(k_x3, (b3, s3, d3), jnp.float32).astype(jnp.bfloat16)
    out3 = jax.block_until_ready(rmsnorm(x3, weight3, eps=eps))
    assert out3.dtype == jnp.bfloat16
    assert jnp.allclose(out3.astype(jnp.float32), ref_rmsnorm(x3, weight3, eps),
                        atol=2e-2, rtol=2e-2), "bf16 mismatch vs reference"

    print("KERNEL_OK")
</pallas_src>

<mosaic_0001>
module attributes {stable_mosaic.version = 11 : i64} {
  func.func @_rmsnorm_kernel(%arg0: i32, %arg1: memref<8x128xf32, #tpu.memory_space<vmem>>, %arg2: memref<1x128xf32, #tpu.memory_space<vmem>>, %arg3: memref<8x128xf32, #tpu.memory_space<vmem>>) attributes {dimension_semantics = [#tpu.dimension_semantics<parallel>], iteration_bounds = array<i64: 2>, scalar_prefetch = 0 : i64, scratch_operands = 0 : i64, tpu.core_type = #tpu.core_type<tc>, window_params = [{transform_indices = @transform_0, window_bounds = array<i64: 8, 128>}, {pipeline_mode = #tpu.pipeline_mode<synchronous>, transform_indices = @transform_1, window_bounds = array<i64: 1, 128>}, {transform_indices = @transform_2, window_bounds = array<i64: 8, 128>}]} {
    %c0 = arith.constant 0 : index
    %c0_0 = arith.constant 0 : index
    %0 = vector.load %arg1[%c0, %c0_0] : memref<8x128xf32, #tpu.memory_space<vmem>>, vector<8x128xf32>
    %1 = arith.mulf %0, %0 : vector<8x128xf32>
    %cst = arith.constant dense<0.000000e+00> : vector<8xf32>
    %2 = vector.multi_reduction <add>, %1, %cst [1] : vector<8x128xf32> to vector<8xf32>
    %3 = vector.shape_cast %2 : vector<8xf32> to vector<8x1xf32>
    %cst_1 = arith.constant 9.99999997E-7 : f32
    %4 = vector.broadcast %cst_1 : f32 to vector<8x1xf32>
    %5 = arith.addf %3, %4 : vector<8x1xf32>
    %6 = math.rsqrt %5 : vector<8x1xf32>
    %c0_2 = arith.constant 0 : index
    %c0_3 = arith.constant 0 : index
    %7 = vector.load %arg2[%c0_2, %c0_3] : memref<1x128xf32, #tpu.memory_space<vmem>>, vector<1x128xf32>
    %8 = vector.broadcast %7 : vector<1x128xf32> to vector<8x128xf32>
    %9 = arith.mulf %8, %0 : vector<8x128xf32>
    %10 = vector.broadcast %6 : vector<8x1xf32> to vector<8x128xf32>
    %11 = arith.mulf %9, %10 : vector<8x128xf32>
    %c0_4 = arith.constant 0 : index
    %c0_5 = arith.constant 0 : index
    %12 = vector.load %arg3[%c0_4, %c0_5] : memref<8x128xf32, #tpu.memory_space<vmem>>, vector<8x128xf32>
    tpu.vector_store %arg3[%c0_4, %c0_5], %11 {strides = array<i32>} : memref<8x128xf32, #tpu.memory_space<vmem>>, vector<8x128xf32>,
    return
  }
  func.func @transform_0(%arg0: i32) -> (i32, i32) {
    %c0_i32 = arith.constant 0 : i32
    %c0_i32_0 = arith.constant 0 : i32
    return %arg0, %c0_i32 : i32, i32
  }
  func.func @transform_1(%arg0: i32) -> (i32, i32) {
    %c0_i32 = arith.constant 0 : i32
    %c0_i32_0 = arith.constant 0 : i32
    %c0_i32_1 = arith.constant 0 : i32
    return %c0_i32, %c0_i32_0 : i32, i32
  }
  func.func @transform_2(%arg0: i32) -> (i32, i32) {
    %c0_i32 = arith.constant 0 : i32
    %c0_i32_0 = arith.constant 0 : i32
    return %arg0, %c0_i32 : i32, i32
  }
}

</mosaic_0001>

<bundles_post_ra>
// kernel: tpu_custom_call.1
= control target key start
LH: loop header
LB: loop body
LE: loop exit
PB: predicated region body
PF: predicated region fallthrough
CT: control target
= control target key end

     0   :  { %7 = vsyncpa [#allocation3], 0  ;;  %s599_s0 = inlined_call_operand.hbm [shape: f32[16,128], index: 0, kind: input, shape index: {}]   ;;  %s600_s1 = inlined_call_operand.vmem [shape: f32[1,128], index: 1, kind: input, shape index: {}]   ;;  %s601_s2 = inlined_call_operand.hbm [shape: f32[16,128], index: 2, kind: output, shape index: {}]  }
   0x1   :  { %9 = vsyncpa [#allocation3 + $0x1], 0 }
   0x2   :  { %10 = vsyncpa [#allocation4], 0 }
   0x3   :  { %12 = vsyncpa [#allocation4 + $0x1], 0  ;;  %s435_s9 = smov 0   ;;  %s437_s10 = smov 0  }
   0x4   :  { %s439_s11 = smov 0   ;;  %s441_s12 = smov 0  }
   0x5 LB: > { %s456_s13 = sadd.s32 4294967295, %s416_s12   ;;  %s259_s14 = sadd.s32 4294967294, %s416_s12   ;;  %s416_s12 = sphi %s441_s12, %s616_s12   ;;  %s412_s11 = sphi %s439_s11, %s615_s11   ;;  %s408_s10 = sphi %s437_s10, %s614_s10   ;;  %s404_s9 = sphi %s435_s9, %s613_s9  }
   0x6   : > { %s460_s15 = sadd.s32 1, %s416_s12   ;;  %s25_s16 = sadd.s32 1, %s412_s11 }
   0x7   : > { %s22_s17 = ssub.s32 %s416_s12, %s460_s15  ;;  %p32_p0 = scmp.ne.s32.totalorder %s412_s11, %s408_s10 }
   0x8   : > { %p23_p1 = scmp.eq.s32.totalorder %s22_s17, 0  ;;  %p33_p2 = scmp.eq.s32.totalorder %s416_s12, 0 }
   0x9   : > { %p38_p3 = scmp.ne.s32.totalorder %s408_s10, %s404_s9  ;;  %p39_p4 = scmp.eq.s32.totalorder %s456_s13, 0 }
   0xa   : > { %s472_s18 = scalar_select %p23_p1, %s412_s11, %s25_s16  }
   0xb   : > { %p474_p5 = por %p33_p2, %p32_p0  ;;  %p478_p6 = por %p39_p4, %p38_p3 }
   0xc   : > { %p83_p7 = scmp.eq.s32.totalorder %s456_s13, 1  ;;  %p89_p8 = scmp.eq.s32.totalorder %s259_s14, 1 }
   0xd   : > { %p284_p10 = scmp.lt.s32.totalorder %s416_s12, 2  ;;  %s112_s23 = sand.u32 1, %s412_s11  }
   0xe   : > { %p485_p11 = por %p83_p7, %p32_p0  ;;  %p489_p12 = por %p89_p8, %p38_p3 }
   0xf   : > { %s263_s24 = sshll.u32 %s416_s12, 7  ;;  %s262_s25 = sshll.u32 %s112_s23, 3 }
  0x10   : > { %s605_s21 = scalar_select %p485_p11, 1, 0 }
  0x11   : > { %s606_s22 = scalar_select %p489_p12, 1, 0 }
  0x12   : > { %s498_s28 = scalar_lea.hbm %s599_s0, %s263_s24  ;;  %s116_s29 = scalar_lea.vmem [#allocation2], %s262_s25 }
  0x13   : > { %s123_s30 = sshll.u32 %s116_s29, 4  ;;  %p502_p13 = pnand %p284_p10, %p474_p5  ;;  %s506_s30 = int_to_ptr.vmem [resolvable:$true] %s123_s30 }
  0x14   : > { %s113_s4 = scalar_lea.sflag [#allocation3], %s112_s23  ;;  %s320_s5 = scalar_lea.hbm %s498_s28, 128 }
  0x15   : > { %p321_p2 = scmp.ne.s32.totalorder %s498_s28, %s320_s5  ;;  %p322_p3 = pneg %p502_p13 }
  0x16   : > { %s325_s8 = scalar_lea.hbm %s599_s0, 256  ;;  %p326_p5 = scmp.lt.u32.totalorder %s498_s28, %s599_s0 }
  0x17   : > { %p323_p4 = pnand %p322_p3, %p321_p2  ;;  %p327_p8 = scmp.lt.u32.totalorder %s325_s8, %s320_s5 }
  0x18   : > { %p329_p9 = scmp.lt.u32.totalorder %s320_s5, %s498_s28 }
  0x19   : > { %p324_p7 = pneg %p323_p4  ;;  %p328_p10 = por %p327_p8, %p326_p5 }
  0x1b   : > { %p330_p0 = por %p329_p9, %p328_p10 }
  0x1d   : > { %p331_p1 = pnand %p330_p0, %p324_p7 }
  0x1f   : > { %334 = shalt.err (!%p331_p1)
}
  0x20   : > { %s335_s17 = scalar_lea.vmem %s506_s30, 128  ;;  %s418_s19 = smov [#allocation2]  }
  0x21   : > { %p336_p2 = scmp.ne.s32.totalorder %s506_s30, %s335_s17  ;;  %s340_s23 = sshll.u32 %s418_s19, 4  ;;  %s341_s23 = int_to_ptr.vmem [resolvable:$false] %s340_s23 }
  0x22   : > { %s342_s24 = scalar_lea.vmem %s341_s23, 256  ;;  %p343_p11 = scmp.lt.s32.totalorder %s506_s30, %s341_s23 }
  0x23   : > { %p338_p4 = pnand %p336_p2, %p322_p3  ;;  %p344_p5 = scmp.lt.s32.totalorder %s342_s24, %s335_s17 }
  0x25   : > { %p339_p12 = pneg %p338_p4  ;;  %p345_p8 = por %p344_p5, %p343_p11 }
  0x27   : > { %p346_p9 = pnand %p345_p8, %p339_p12 }
  0x29   : > { %349 = shalt.err (!%p346_p9)
}
  0x2a   : > { %279 = dma.hbm_to_vmem [thread:$0]  (!%p502_p13), %s498_s28, 128, %s506_s30, %s113_s4  }
  0x2b   : > { %p608_p0 = scmp.lt.s32.totalorder %s416_s12, 3  ;;  %p609_p1 = scmp.ge.s32.totalorder %s416_s12, 1 }
  0x2d   : > { %p129_p3 = pnand %p609_p1, %p608_p0 }
  0x2e   : > { %s540_s25 = sand.u32 (!%p129_p3), 1, %s408_s10  }
  0x2f   : > { %132 = sbr.rel (%p129_p3) target bundleno = 229 (0xe5), region = 28  ;;  %s265_s26 = sshll.u32 (!%p129_p3), %s540_s25, 3 }
  0x30   : > { %s135_s27 = scalar_lea.sflag (!%p129_p3), [#allocation3], %s540_s25  ;;  %s138_s29 = scalar_lea.vmem (!%p129_p3), [#allocation2], %s265_s26 }
  0x36   : > { %395 = dma.done.wait (%p478_p6), %s135_s27, 128  }
  0x37   : > { %397 = vsyncadd (%p478_p6), %s135_s27, 4294967168  ;;  %v159_v0 = vld [vmem:[%s138_s29] sm:$0xff]  ;;  %s269_s3 = sshll.u32 %s456_s13, 7  ;;  %s158_s4 = scalar_lea.vmem [#allocation5], %s265_s26 }
  0x38   : > { %v160_v1 = vmul.f32 %v159_v0, %v159_v0  ;;  %v267_v4 = vld [vmem:[%s600_s1] ss:$0 sm:$0xff]  ;;  %s189_s5 = sshll.u32 %s158_s4, 4  ;;  %s555_s7 = scalar_lea.hbm %s601_s2, %s269_s3  ;;  %s557_s5 = int_to_ptr.vmem [resolvable:$true] %s189_s5 }
  0x39   : > { %v172_v5 = vmul.f32 %v267_v4, %v159_v0  ;;  %s176_s8 = scalar_lea.sflag [#allocation4], %s540_s25  ;;  %s350_s14 = scalar_lea.vmem %s557_s5, 128 }
  0x3a   : > { %161 = vadd.xlane.f32.xlu0 %v160_v1  ;;  %p351_p6 = scmp.ne.s32.totalorder %s557_s5, %s350_s14  ;;  %p610_p11 = scmp.ne.s32.totalorder %s605_s21, 0 }
  0x3b   : > { %s419_s13 = smov [#allocation5]  }
  0x3c   : > { %p352_p12 = pnand %p351_p6, %p610_p11  ;;  %s354_s16 = sshll.u32 %s419_s13, 4  ;;  %s355_s16 = int_to_ptr.vmem [resolvable:$false] %s354_s16 }
  0x3d   : > { %s356_s17 = scalar_lea.vmem %s355_s16, 256  ;;  %p357_p7 = scmp.lt.s32.totalorder %s557_s5, %s355_s16 }
  0x3e   : > { %p353_p13 = pneg %p352_p12  ;;  %p358_p10 = scmp.lt.s32.totalorder %s356_s17, %s350_s14 }
  0x40   : > { %p359_p2 = por %p358_p10, %p357_p7 }
  0x42   : > { %p360_p4 = pnand %p359_p2, %p353_p13 }
  0xc7   : > { %v162_v2 = vpop.xlane.xlu0 %161 }
  0xc8   : > { %v163_v3 = vadd.f32 1e-06, %v162_v2 }
  0xca   : > { %318 = vrsqrt.f32 %v163_v3 }
  0xd4   : > { %v319_v6 = vpop.eup %318 }
  0xd5   : > { %v173_v7 = vmul.f32 %v319_v6, %v172_v5 }
  0xd7   : > { %174 = vst [vmem:[%s158_s4] sm:$0xff] %v173_v7 }
  0xd8   : > { %363 = shalt.err (!%p360_p4)
}
  0xd9   : > { %s364_s19 = scalar_lea.hbm %s555_s7, 128  ;;  %s368_s25 = scalar_lea.hbm %s601_s2, 256 }
  0xda   : > { %p365_p5 = scmp.ne.s32.totalorder %s555_s7, %s364_s19  ;;  %p369_p0 = scmp.lt.u32.totalorder %s555_s7, %s601_s2 }
  0xdb   : > { %p370_p1 = scmp.lt.u32.totalorder %s368_s25, %s364_s19  ;;  %p372_p6 = scmp.lt.u32.totalorder %s364_s19, %s555_s7 }
  0xdc   : > { %p366_p8 = pnand %p365_p5, %p610_p11 }
  0xdd   : > { %p371_p3 = por %p370_p1, %p369_p0 }
  0xde   : > { %p367_p9 = pneg %p366_p8 }
  0xdf   : > { %p373_p12 = por %p372_p6, %p371_p3 }
  0xe1   : > { %p374_p13 = pnand %p373_p12, %p367_p9 }
  0xe3   : > { %377 = shalt.err (!%p374_p13)
}
  0xe4   : > { %274 = dma.vmem_to_hbm [thread:$0]  (%p610_p11), %s557_s5, 128, %s555_s7, %s176_s8  }
  0xe5 PF: > { %s201_s29 = sand.u32 1, %s404_s9   ;;  %p611_p7 = scmp.ne.s32.totalorder %s606_s22, 0 }
  0xe6   : > { %p612_p10 = scmp.ge.s32.totalorder %s416_s12, 2  ;;  %s202_s28 = scalar_lea.sflag [#allocation4], %s201_s29 }
  0xe8   : > { %p281_p2 = pnand %p612_p10, %p611_p7 }
  0xea   : > { %399 = dma.done.wait (!%p281_p2), %s202_s28, 128  }
  0xeb   : > { %401 = vsyncadd (!%p281_p2), %s202_s28, 4294967168  ;;  %p15_p4 = scmp.ge.s32.totalorder %s460_s15, 4   ;;  %s613_s9 = smov %s408_s10 }
  0xec   : > { %s614_s10 = smov %s412_s11  ;;  %s615_s11 = smov %s472_s18 }
  0xed   : > { %s616_s12 = smov %s460_s15  ;;  %17 = sbr.rel (!%p15_p4) target bundleno = 5 (0x5), region = 73 }
  0xf4   :  { %207 = vsyncpa [#allocation3], 1 }
  0xf5   :  { %209 = vsyncpa [#allocation3 + $0x1], 1 }
  0xf6   :  { %210 = vsyncpa [#allocation4], 1 }
  0xf7   :  { %212 = vsyncpa [#allocation4 + $0x1], 1 }

</bundles_post_ra>
